<compile_context>
chip_gen: v7x
topology: tpu7x:2x2x1
jax: 0.10.0
libtpu: 0.0.40
codegen_flags: <defaults>
</compile_context>

<pallas_src>
import numpy as np
import jax
import jax.numpy as jnp
from jax import lax
from jax.experimental import pallas as pl
from jax.experimental.pallas import tpu as pltpu


def _round_up(a: int, b: int) -> int:
    return (a + b - 1) // b * b


def _make_kaf_kernel(D, tile_rows, ch_rows, unroll, prep_fn, point_fn):
    """Builds the per-tile kernel.

    x_ref     : (tile_rows, tf) VMEM input tile
    alpha_ref : (D, tf)         VMEM mixing coefficients (lane-expanded, folded)
    o_ref     : (tile_rows, tf) VMEM output tile

    prep_fn(x)        -> per-chunk precomputation (e.g. s = -gamma * x * x)
    point_fn(d, x, s) -> gaussian kernel value for dictionary point d
    """
    n_full = tile_rows // ch_rows
    rem = tile_rows - n_full * ch_rows
    unroll = max(1, min(unroll, n_full if n_full > 0 else 1))

    def kernel(x_ref, alpha_ref, o_ref):
        def do_chunk(r, rows):
            x = x_ref[pl.ds(r, rows), :]            # chunk stays in vregs
            s = prep_fn(x)
            # Two accumulators halve the critical path of the D-deep add chain.
            acc0 = jnp.zeros_like(x)
            acc1 = jnp.zeros_like(x)
            for d in range(D):                      # D small (20): static unroll
                # alpha row broadcast over sublanes (vld slots have slack);
                # exp goes to the EUP slot, mul/add to the VPU.
                term = point_fn(d, x, s) * alpha_ref[d, :]
                if d % 2 == 0:
                    acc0 = acc0 + term
                else:
                    acc1 = acc1 + term
            o_ref[pl.ds(r, rows), :] = acc0 + acc1

        if n_full > 0:
            def chunk_body(c, carry):
                do_chunk(pl.multiple_of(c * ch_rows, ch_rows), ch_rows)
                return carry
            lax.fori_loop(0, n_full, chunk_body, 0, unroll=unroll)
        if rem > 0:
            do_chunk(n_full * ch_rows, rem)         # static remainder chunk

    return kernel


def kaf_forward(x, alpha_df, dict_pts, gamma, *, tn=1024, tf=512):
    """Gaussian KAF forward.

    x        : (N, F) activations
    alpha_df : (D, F) mixing coefficients (torch alpha (1, F, D) transposed)
    dict_pts : (D,)   dictionary points (fixed buffer; numpy or jnp)
    gamma    : (D,)   per-point gamma   (fixed buffer; numpy or jnp)
    returns  : (N, F) f32
    """
    x = jnp.asarray(x, jnp.float32)
    alpha_df = jnp.asarray(alpha_df, jnp.float32)
    dict_np = np.asarray(dict_pts, np.float32).reshape(-1)
    gamma_np = np.asarray(gamma, np.float32).reshape(-1)

    N, F = x.shape
    D = int(dict_np.shape[0])

    # The module's gaussian buffer always holds one shared gamma value; detect
    # it to enable the factored exponent, keep a general per-point fallback.
    shared_gamma = bool(np.all(gamma_np == gamma_np[0]))

    # ---- lane-densify the feature axis --------------------------------------
    if F < 128 and 128 % F == 0:
        rep = 128 // F          # fold `rep` batch rows into the 128-lane axis
    else:
        rep = 1

    if rep > 1:
        n_rows = _round_up(N, rep)
        if n_rows != N:
            x = jnp.pad(x, ((0, n_rows - N), (0, 0)))
        n_eff = n_rows // rep
        x_eff = x.reshape(n_eff, rep * F)        # row-major reshape: free
        alpha_eff = jnp.tile(alpha_df, (1, rep))
        F_eff = rep * F
    else:
        n_eff, F_eff = N, F
        x_eff, alpha_eff = x, alpha_df

    # ---- arithmetic restructuring -------------------------------------------
    if shared_gamma:
        g = float(gamma_np[0])
        b_vals = tuple(float(v) for v in (2.0 * g * dict_np))          # 2*g*d_j
        c_fold = np.exp(-g * dict_np.astype(np.float64) ** 2)          # exp(-g*d_j^2)
        alpha_eff = alpha_eff * jnp.asarray(c_fold, jnp.float32)[:, None]
        neg_g = -g

        def prep_fn(xc):
            return (xc * xc) * neg_g                                    # s = -g*x^2

        def point_fn(d, xc, s):
            return jnp.exp(xc * b_vals[d] + s)                          # 4 VALU ops/d
    else:
        dict_vals = tuple(float(v) for v in dict_np)
        ng_vals = tuple(float(v) for v in (-gamma_np))

        def prep_fn(xc):
            return None

        def point_fn(d, xc, s):
            diff = xc - dict_vals[d]
            return jnp.exp((diff * diff) * ng_vals[d])                  # 5 VALU ops/d

    # ---- tiling: cdiv grid, partial edge blocks instead of host padding ------
    tf_eff = F_eff if F_eff <= tf else tf             # tf is a multiple of 128
    f_blocks = pl.cdiv(F_eff, tf_eff)

    if n_eff <= 256:
        tn_eff = n_eff                                # single full-dim row block
    else:
        n_blocks_target = max(1, pl.cdiv(n_eff, tn))
        if f_blocks == 1:
            # On v7x all megacore parallelism must come from the row axis:
            # use an even (>=2) number of row blocks so both TCs stay busy.
            n_blocks_target = max(2, n_blocks_target)
            if n_blocks_target % 2:
                n_blocks_target += 1
        tn_eff = _round_up(pl.cdiv(n_eff, n_blocks_target), 8)
    n_blocks = pl.cdiv(n_eff, tn_eff)

    # Row-chunk size: x / s / 2 accumulators / temps stay resident in vregs
    # across the (unrolled) D loop.
    ch_rows = max(8, min(32, ((8192 // max(tf_eff, 128)) // 8) * 8))
    ch_rows = min(ch_rows, tn_eff)

    kernel = _make_kaf_kernel(D, tn_eff, ch_rows, 2, prep_fn, point_fn)

    y_eff = pl.pallas_call(
        kernel,
        out_shape=jax.ShapeDtypeStruct((n_eff, F_eff), jnp.float32),
        grid=(f_blocks, n_blocks),                    # rows innermost: alpha reused
        in_specs=[
            pl.BlockSpec((tn_eff, tf_eff), lambda jf, ir: (ir, jf)),   # x tile
            pl.BlockSpec((D, tf_eff), lambda jf, ir: (0, jf)),         # alpha tile
        ],
        out_specs=pl.BlockSpec((tn_eff, tf_eff), lambda jf, ir: (ir, jf)),
        compiler_params=pltpu.CompilerParams(
            dimension_semantics=("parallel", "parallel"),   # v7x: 2 TCs shard grid
            vmem_limit_bytes=32 * 1024 * 1024),
    )(x_eff, alpha_eff)

    # ---- undo lane folding ----------------------------------------------------
    if rep > 1:
        y = y_eff.reshape(n_eff * rep, F)[:N]
    else:
        y = y_eff
    return y


def kaf_reference(x, alpha_df, dict_1d, gamma_1d):
    # Pure-JAX reference matching the PyTorch forward (conv=False, gaussian).
    diff = x[:, :, None] - dict_1d[None, None, :]
    K = jnp.exp(-gamma_1d[None, None, :] * diff * diff)
    alpha = alpha_df.T[None, :, :]                    # (1, F, D)
    return jnp.sum(K * alpha, axis=2)


if __name__ == "__main__":
    # Module config (matches KAF(num_parameters=32, D=20, conv=False,
    # boundary=4.0, kernel='gaussian', init_fcn=None)).
    F_feat, D, boundary, N = 32, 20, 4.0, 8

    # Dictionary + gamma buffers (deterministic, same as __init__).
    dict_np = np.linspace(-boundary, boundary, D).astype(np.float32)
    interval = float(dict_np[1] - dict_np[0])
    sigma = 2.0 * interval
    gamma_np = np.full((D,), 0.5 / (sigma * sigma), dtype=np.float32)

    # Parameters: alpha ~ Normal(0, 0.8) as in reset_parameters(); deterministic.
    key = jax.random.PRNGKey(0)
    k_alpha, k_x, k_a2, k_x2 = jax.random.split(key, 4)
    alpha_df = (0.8 * jax.random.normal(k_alpha, (D, F_feat))).astype(jnp.float32)
    x = jax.random.normal(k_x, (N, F_feat), dtype=jnp.float32)

    # 1) main path: shared gamma, lane-folded small F
    y = jax.block_until_ready(kaf_forward(x, alpha_df, dict_np, gamma_np))
    y_ref = kaf_reference(x, alpha_df, jnp.asarray(dict_np), jnp.asarray(gamma_np))
    np.testing.assert_allclose(np.asarray(y), np.asarray(y_ref), rtol=1e-4, atol=5e-5)

    # 2) per-point-gamma fallback path (buffer shape allows it in principle)
    gamma_var = (gamma_np * np.linspace(0.8, 1.2, D)).astype(np.float32)
    y2 = jax.block_until_ready(kaf_forward(x, alpha_df, dict_np, gamma_var))
    y2_ref = kaf_reference(x, alpha_df, jnp.asarray(dict_np), jnp.asarray(gamma_var))
    np.testing.assert_allclose(np.asarray(y2), np.asarray(y2_ref), rtol=1e-4, atol=5e-5)

    # 3) rep==1 path with non-divisible N (partial edge blocks, no host padding)
    N2, F2 = 300, 256
    alpha2 = (0.8 * jax.random.normal(k_a2, (D, F2))).astype(jnp.float32)
    x2 = jax.random.normal(k_x2, (N2, F2), dtype=jnp.float32)
    y3 = jax.block_until_ready(kaf_forward(x2, alpha2, dict_np, gamma_np))
    y3_ref = kaf_reference(x2, alpha2, jnp.asarray(dict_np), jnp.asarray(gamma_np))
    np.testing.assert_allclose(np.asarray(y3), np.asarray(y3_ref), rtol=1e-4, atol=5e-5)

    print("KERNEL_OK")
</pallas_src>

<mosaic_0001>
module attributes {stable_mosaic.version = 11 : i64} {
  func.func @kernel(%arg0: i32, %arg1: i32, %arg2: memref<2x128xf32, #tpu.memory_space<vmem>>, %arg3: memref<20x128xf32, #tpu.memory_space<vmem>>, %arg4: memref<2x128xf32, #tpu.memory_space<vmem>>) attributes {dimension_semantics = [#tpu.dimension_semantics<parallel>, #tpu.dimension_semantics<parallel>], iteration_bounds = array<i64: 1, 1>, scalar_prefetch = 0 : i64, scratch_operands = 0 : i64, tpu.core_type = #tpu.core_type<tc>, window_params = [{transform_indices = @transform_0, window_bounds = array<i64: 2, 128>}, {transform_indices = @transform_1, window_bounds = array<i64: 20, 128>}, {transform_indices = @transform_2, window_bounds = array<i64: 2, 128>}]} {
    %c0_i32 = arith.constant 0 : i32
    %c2_i32 = arith.constant 2 : i32
    %0 = arith.muli %c0_i32, %c2_i32 : i32
    %1 = tpu.assume_multiple %0, 2 : i32
    %2 = arith.index_cast %1 : i32 to index
    %c0 = arith.constant 0 : index
    %3 = vector.load %arg2[%2, %c0] : memref<2x128xf32, #tpu.memory_space<vmem>>, vector<2x128xf32>
    %4 = arith.mulf %3, %3 : vector<2x128xf32>
    %cst = arith.constant -0.705077887 : f32
    %5 = vector.broadcast %cst : f32 to vector<2x128xf32>
    %6 = arith.mulf %4, %5 : vector<2x128xf32>
    %cst_0 = arith.constant 0.000000e+00 : f32
    %7 = vector.broadcast %cst_0 : f32 to vector<2x128xf32>
    %cst_1 = arith.constant 0.000000e+00 : f32
    %8 = vector.broadcast %cst_1 : f32 to vector<2x128xf32>
    %cst_2 = arith.constant -5.64062309 : f32
    %9 = vector.broadcast %cst_2 : f32 to vector<2x128xf32>
    %10 = arith.mulf %3, %9 : vector<2x128xf32>
    %11 = arith.addf %10, %6 : vector<2x128xf32>
    %12 = math.exp %11 : vector<2x128xf32>
    %c0_3 = arith.constant 0 : index
    %c0_4 = arith.constant 0 : index
    %13 = vector.load %arg3[%c0_3, %c0_4] : memref<20x128xf32, #tpu.memory_space<vmem>>, vector<1x128xf32>
    %14 = vector.shape_cast %13 : vector<1x128xf32> to vector<128xf32>
    %15 = vector.shape_cast %14 : vector<128xf32> to vector<1x128xf32>
    %16 = vector.broadcast %15 : vector<1x128xf32> to vector<2x128xf32>
    %17 = arith.mulf %12, %16 : vector<2x128xf32>
    %18 = arith.addf %7, %17 : vector<2x128xf32>
    %cst_5 = arith.constant -5.04687309 : f32
    %19 = vector.broadcast %cst_5 : f32 to vector<2x128xf32>
    %20 = arith.mulf %3, %19 : vector<2x128xf32>
    %21 = arith.addf %20, %6 : vector<2x128xf32>
    %22 = math.exp %21 : vector<2x128xf32>
    %c1 = arith.constant 1 : index
    %c0_6 = arith.constant 0 : index
    %23 = vector.load %arg3[%c1, %c0_6] : memref<20x128xf32, #tpu.memory_space<vmem>>, vector<1x128xf32>
    %24 = vector.shape_cast %23 : vector<1x128xf32> to vector<128xf32>
    %25 = vector.shape_cast %24 : vector<128xf32> to vector<1x128xf32>
    %26 = vector.broadcast %25 : vector<1x128xf32> to vector<2x128xf32>
    %27 = arith.mulf %22, %26 : vector<2x128xf32>
    %28 = arith.addf %8, %27 : vector<2x128xf32>
    %cst_7 = arith.constant -4.45312357 : f32
    %29 = vector.broadcast %cst_7 : f32 to vector<2x128xf32>
    %30 = arith.mulf %3, %29 : vector<2x128xf32>
    %31 = arith.addf %30, %6 : vector<2x128xf32>
    %32 = math.exp %31 : vector<2x128xf32>
    %c2 = arith.constant 2 : index
    %c0_8 = arith.constant 0 : index
    %33 = vector.load %arg3[%c2, %c0_8] : memref<20x128xf32, #tpu.memory_space<vmem>>, vector<1x128xf32>
    %34 = vector.shape_cast %33 : vector<1x128xf32> to vector<128xf32>
    %35 = vector.shape_cast %34 : vector<128xf32> to vector<1x128xf32>
    %36 = vector.broadcast %35 : vector<1x128xf32> to vector<2x128xf32>
    %37 = arith.mulf %32, %36 : vector<2x128xf32>
    %38 = arith.addf %18, %37 : vector<2x128xf32>
    %cst_9 = arith.constant -3.85937381 : f32
    %39 = vector.broadcast %cst_9 : f32 to vector<2x128xf32>
    %40 = arith.mulf %3, %39 : vector<2x128xf32>
    %41 = arith.addf %40, %6 : vector<2x128xf32>
    %42 = math.exp %41 : vector<2x128xf32>
    %c3 = arith.constant 3 : index
    %c0_10 = arith.constant 0 : index
    %43 = vector.load %arg3[%c3, %c0_10] : memref<20x128xf32, #tpu.memory_space<vmem>>, vector<1x128xf32>
    %44 = vector.shape_cast %43 : vector<1x128xf32> to vector<128xf32>
    %45 = vector.shape_cast %44 : vector<128xf32> to vector<1x128xf32>
    %46 = vector.broadcast %45 : vector<1x128xf32> to vector<2x128xf32>
    %47 = arith.mulf %42, %46 : vector<2x128xf32>
    %48 = arith.addf %28, %47 : vector<2x128xf32>
    %cst_11 = arith.constant -3.26562381 : f32
    %49 = vector.broadcast %cst_11 : f32 to vector<2x128xf32>
    %50 = arith.mulf %3, %49 : vector<2x128xf32>
    %51 = arith.addf %50, %6 : vector<2x128xf32>
    %52 = math.exp %51 : vector<2x128xf32>
    %c4 = arith.constant 4 : index
    %c0_12 = arith.constant 0 : index
    %53 = vector.load %arg3[%c4, %c0_12] : memref<20x128xf32, #tpu.memory_space<vmem>>, vector<1x128xf32>
    %54 = vector.shape_cast %53 : vector<1x128xf32> to vector<128xf32>
    %55 = vector.shape_cast %54 : vector<128xf32> to vector<1x128xf32>
    %56 = vector.broadcast %55 : vector<1x128xf32> to vector<2x128xf32>
    %57 = arith.mulf %52, %56 : vector<2x128xf32>
    %58 = arith.addf %38, %57 : vector<2x128xf32>
    %cst_13 = arith.constant -2.67187405 : f32
    %59 = vector.broadcast %cst_13 : f32 to vector<2x128xf32>
    %60 = arith.mulf %3, %59 : vector<2x128xf32>
    %61 = arith.addf %60, %6 : vector<2x128xf32>
    %62 = math.exp %61 : vector<2x128xf32>
    %c5 = arith.constant 5 : index
    %c0_14 = arith.constant 0 : index
    %63 = vector.load %arg3[%c5, %c0_14] : memref<20x128xf32, #tpu.memory_space<vmem>>, vector<1x128xf32>
    %64 = vector.shape_cast %63 : vector<1x128xf32> to vector<128xf32>
    %65 = vector.shape_cast %64 : vector<128xf32> to vector<1x128xf32>
    %66 = vector.broadcast %65 : vector<1x128xf32> to vector<2x128xf32>
    %67 = arith.mulf %62, %66 : vector<2x128xf32>
    %68 = arith.addf %48, %67 : vector<2x128xf32>
    %cst_15 = arith.constant -2.07812428 : f32
    %69 = vector.broadcast %cst_15 : f32 to vector<2x128xf32>
    %70 = arith.mulf %3, %69 : vector<2x128xf32>
    %71 = arith.addf %70, %6 : vector<2x128xf32>
    %72 = math.exp %71 : vector<2x128xf32>
    %c6 = arith.constant 6 : index
    %c0_16 = arith.constant 0 : index
    %73 = vector.load %arg3[%c6, %c0_16] : memref<20x128xf32, #tpu.memory_space<vmem>>, vector<1x128xf32>
    %74 = vector.shape_cast %73 : vector<1x128xf32> to vector<128xf32>
    %75 = vector.shape_cast %74 : vector<128xf32> to vector<1x128xf32>
    %76 = vector.broadcast %75 : vector<1x128xf32> to vector<2x128xf32>
    %77 = arith.mulf %72, %76 : vector<2x128xf32>
    %78 = arith.addf %58, %77 : vector<2x128xf32>
    %cst_17 = arith.constant -1.48437452 : f32
    %79 = vector.broadcast %cst_17 : f32 to vector<2x128xf32>
    %80 = arith.mulf %3, %79 : vector<2x128xf32>
    %81 = arith.addf %80, %6 : vector<2x128xf32>
    %82 = math.exp %81 : vector<2x128xf32>
    %c7 = arith.constant 7 : index
    %c0_18 = arith.constant 0 : index
    %83 = vector.load %arg3[%c7, %c0_18] : memref<20x128xf32, #tpu.memory_space<vmem>>, vector<1x128xf32>
    %84 = vector.shape_cast %83 : vector<1x128xf32> to vector<128xf32>
    %85 = vector.shape_cast %84 : vector<128xf32> to vector<1x128xf32>
    %86 = vector.broadcast %85 : vector<1x128xf32> to vector<2x128xf32>
    %87 = arith.mulf %82, %86 : vector<2x128xf32>
    %88 = arith.addf %68, %87 : vector<2x128xf32>
    %cst_19 = arith.constant -0.890624642 : f32
    %89 = vector.broadcast %cst_19 : f32 to vector<2x128xf32>
    %90 = arith.mulf %3, %89 : vector<2x128xf32>
    %91 = arith.addf %90, %6 : vector<2x128xf32>
    %92 = math.exp %91 : vector<2x128xf32>
    %c8 = arith.constant 8 : index
    %c0_20 = arith.constant 0 : index
    %93 = vector.load %arg3[%c8, %c0_20] : memref<20x128xf32, #tpu.memory_space<vmem>>, vector<1x128xf32>
    %94 = vector.shape_cast %93 : vector<1x128xf32> to vector<128xf32>
    %95 = vector.shape_cast %94 : vector<128xf32> to vector<1x128xf32>
    %96 = vector.broadcast %95 : vector<1x128xf32> to vector<2x128xf32>
    %97 = arith.mulf %92, %96 : vector<2x128xf32>
    %98 = arith.addf %78, %97 : vector<2x128xf32>
    %cst_21 = arith.constant -0.296874911 : f32
    %99 = vector.broadcast %cst_21 : f32 to vector<2x128xf32>
    %100 = arith.mulf %3, %99 : vector<2x128xf32>
    %101 = arith.addf %100, %6 : vector<2x128xf32>
    %102 = math.exp %101 : vector<2x128xf32>
    %c9 = arith.constant 9 : index
    %c0_22 = arith.constant 0 : index
    %103 = vector.load %arg3[%c9, %c0_22] : memref<20x128xf32, #tpu.memory_space<vmem>>, vector<1x128xf32>
    %104 = vector.shape_cast %103 : vector<1x128xf32> to vector<128xf32>
    %105 = vector.shape_cast %104 : vector<128xf32> to vector<1x128xf32>
    %106 = vector.broadcast %105 : vector<1x128xf32> to vector<2x128xf32>
    %107 = arith.mulf %102, %106 : vector<2x128xf32>
    %108 = arith.addf %88, %107 : vector<2x128xf32>
    %cst_23 = arith.constant 0.296874911 : f32
    %109 = vector.broadcast %cst_23 : f32 to vector<2x128xf32>
    %110 = arith.mulf %3, %109 : vector<2x128xf32>
    %111 = arith.addf %110, %6 : vector<2x128xf32>
    %112 = math.exp %111 : vector<2x128xf32>
    %c10 = arith.constant 10 : index
    %c0_24 = arith.constant 0 : index
    %113 = vector.load %arg3[%c10, %c0_24] : memref<20x128xf32, #tpu.memory_space<vmem>>, vector<1x128xf32>
    %114 = vector.shape_cast %113 : vector<1x128xf32> to vector<128xf32>
    %115 = vector.shape_cast %114 : vector<128xf32> to vector<1x128xf32>
    %116 = vector.broadcast %115 : vector<1x128xf32> to vector<2x128xf32>
    %117 = arith.mulf %112, %116 : vector<2x128xf32>
    %118 = arith.addf %98, %117 : vector<2x128xf32>
    %cst_25 = arith.constant 0.890624642 : f32
    %119 = vector.broadcast %cst_25 : f32 to vector<2x128xf32>
    %120 = arith.mulf %3, %119 : vector<2x128xf32>
    %121 = arith.addf %120, %6 : vector<2x128xf32>
    %122 = math.exp %121 : vector<2x128xf32>
    %c11 = arith.constant 11 : index
    %c0_26 = arith.constant 0 : index
    %123 = vector.load %arg3[%c11, %c0_26] : memref<20x128xf32, #tpu.memory_space<vmem>>, vector<1x128xf32>
    %124 = vector.shape_cast %123 : vector<1x128xf32> to vector<128xf32>
    %125 = vector.shape_cast %124 : vector<128xf32> to vector<1x128xf32>
    %126 = vector.broadcast %125 : vector<1x128xf32> to vector<2x128xf32>
    %127 = arith.mulf %122, %126 : vector<2x128xf32>
    %128 = arith.addf %108, %127 : vector<2x128xf32>
    %cst_27 = arith.constant 1.48437452 : f32
    %129 = vector.broadcast %cst_27 : f32 to vector<2x128xf32>
    %130 = arith.mulf %3, %129 : vector<2x128xf32>
    %131 = arith.addf %130, %6 : vector<2x128xf32>
    %132 = math.exp %131 : vector<2x128xf32>
    %c12 = arith.constant 12 : index
    %c0_28 = arith.constant 0 : index
    %133 = vector.load %arg3[%c12, %c0_28] : memref<20x128xf32, #tpu.memory_space<vmem>>, vector<1x128xf32>
    %134 = vector.shape_cast %133 : vector<1x128xf32> to vector<128xf32>
    %135 = vector.shape_cast %134 : vector<128xf32> to vector<1x128xf32>
    %136 = vector.broadcast %135 : vector<1x128xf32> to vector<2x128xf32>
    %137 = arith.mulf %132, %136 : vector<2x128xf32>
    %138 = arith.addf %118, %137 : vector<2x128xf32>
    %cst_29 = arith.constant 2.07812428 : f32
    %139 = vector.broadcast %cst_29 : f32 to vector<2x128xf32>
    %140 = arith.mulf %3, %139 : vector<2x128xf32>
    %141 = arith.addf %140, %6 : vector<2x128xf32>
    %142 = math.exp %141 : vector<2x128xf32>
    %c13 = arith.constant 13 : index
    %c0_30 = arith.constant 0 : index
    %143 = vector.load %arg3[%c13, %c0_30] : memref<20x128xf32, #tpu.memory_space<vmem>>, vector<1x128xf32>
    %144 = vector.shape_cast %143 : vector<1x128xf32> to vector<128xf32>
    %145 = vector.shape_cast %144 : vector<128xf32> to vector<1x128xf32>
    %146 = vector.broadcast %145 : vector<1x128xf32> to vector<2x128xf32>
    %147 = arith.mulf %142, %146 : vector<2x128xf32>
    %148 = arith.addf %128, %147 : vector<2x128xf32>
    %cst_31 = arith.constant 2.67187405 : f32
    %149 = vector.broadcast %cst_31 : f32 to vector<2x128xf32>
    %150 = arith.mulf %3, %149 : vector<2x128xf32>
    %151 = arith.addf %150, %6 : vector<2x128xf32>
    %152 = math.exp %151 : vector<2x128xf32>
    %c14 = arith.constant 14 : index
    %c0_32 = arith.constant 0 : index
    %153 = vector.load %arg3[%c14, %c0_32] : memref<20x128xf32, #tpu.memory_space<vmem>>, vector<1x128xf32>
    %154 = vector.shape_cast %153 : vector<1x128xf32> to vector<128xf32>
    %155 = vector.shape_cast %154 : vector<128xf32> to vector<1x128xf32>
    %156 = vector.broadcast %155 : vector<1x128xf32> to vector<2x128xf32>
    %157 = arith.mulf %152, %156 : vector<2x128xf32>
    %158 = arith.addf %138, %157 : vector<2x128xf32>
    %cst_33 = arith.constant 3.26562381 : f32
    %159 = vector.broadcast %cst_33 : f32 to vector<2x128xf32>
    %160 = arith.mulf %3, %159 : vector<2x128xf32>
    %161 = arith.addf %160, %6 : vector<2x128xf32>
    %162 = math.exp %161 : vector<2x128xf32>
    %c15 = arith.constant 15 : index
    %c0_34 = arith.constant 0 : index
    %163 = vector.load %arg3[%c15, %c0_34] : memref<20x128xf32, #tpu.memory_space<vmem>>, vector<1x128xf32>
    %164 = vector.shape_cast %163 : vector<1x128xf32> to vector<128xf32>
    %165 = vector.shape_cast %164 : vector<128xf32> to vector<1x128xf32>
    %166 = vector.broadcast %165 : vector<1x128xf32> to vector<2x128xf32>
    %167 = arith.mulf %162, %166 : vector<2x128xf32>
    %168 = arith.addf %148, %167 : vector<2x128xf32>
    %cst_35 = arith.constant 3.85937381 : f32
    %169 = vector.broadcast %cst_35 : f32 to vector<2x128xf32>
    %170 = arith.mulf %3, %169 : vector<2x128xf32>
    %171 = arith.addf %170, %6 : vector<2x128xf32>
    %172 = math.exp %171 : vector<2x128xf32>
    %c16 = arith.constant 16 : index
    %c0_36 = arith.constant 0 : index
    %173 = vector.load %arg3[%c16, %c0_36] : memref<20x128xf32, #tpu.memory_space<vmem>>, vector<1x128xf32>
    %174 = vector.shape_cast %173 : vector<1x128xf32> to vector<128xf32>
    %175 = vector.shape_cast %174 : vector<128xf32> to vector<1x128xf32>
    %176 = vector.broadcast %175 : vector<1x128xf32> to vector<2x128xf32>
    %177 = arith.mulf %172, %176 : vector<2x128xf32>
    %178 = arith.addf %158, %177 : vector<2x128xf32>
    %cst_37 = arith.constant 4.45312357 : f32
    %179 = vector.broadcast %cst_37 : f32 to vector<2x128xf32>
    %180 = arith.mulf %3, %179 : vector<2x128xf32>
    %181 = arith.addf %180, %6 : vector<2x128xf32>
    %182 = math.exp %181 : vector<2x128xf32>
    %c17 = arith.constant 17 : index
    %c0_38 = arith.constant 0 : index
    %183 = vector.load %arg3[%c17, %c0_38] : memref<20x128xf32, #tpu.memory_space<vmem>>, vector<1x128xf32>
    %184 = vector.shape_cast %183 : vector<1x128xf32> to vector<128xf32>
    %185 = vector.shape_cast %184 : vector<128xf32> to vector<1x128xf32>
    %186 = vector.broadcast %185 : vector<1x128xf32> to vector<2x128xf32>
    %187 = arith.mulf %182, %186 : vector<2x128xf32>
    %188 = arith.addf %168, %187 : vector<2x128xf32>
    %cst_39 = arith.constant 5.04687309 : f32
    %189 = vector.broadcast %cst_39 : f32 to vector<2x128xf32>
    %190 = arith.mulf %3, %189 : vector<2x128xf32>
    %191 = arith.addf %190, %6 : vector<2x128xf32>
    %192 = math.exp %191 : vector<2x128xf32>
    %c18 = arith.constant 18 : index
    %c0_40 = arith.constant 0 : index
    %193 = vector.load %arg3[%c18, %c0_40] : memref<20x128xf32, #tpu.memory_space<vmem>>, vector<1x128xf32>
    %194 = vector.shape_cast %193 : vector<1x128xf32> to vector<128xf32>
    %195 = vector.shape_cast %194 : vector<128xf32> to vector<1x128xf32>
    %196 = vector.broadcast %195 : vector<1x128xf32> to vector<2x128xf32>
    %197 = arith.mulf %192, %196 : vector<2x128xf32>
    %198 = arith.addf %178, %197 : vector<2x128xf32>
    %cst_41 = arith.constant 5.64062309 : f32
    %199 = vector.broadcast %cst_41 : f32 to vector<2x128xf32>
    %200 = arith.mulf %3, %199 : vector<2x128xf32>
    %201 = arith.addf %200, %6 : vector<2x128xf32>
    %202 = math.exp %201 : vector<2x128xf32>
    %c19 = arith.constant 19 : index
    %c0_42 = arith.constant 0 : index
    %203 = vector.load %arg3[%c19, %c0_42] : memref<20x128xf32, #tpu.memory_space<vmem>>, vector<1x128xf32>
    %204 = vector.shape_cast %203 : vector<1x128xf32> to vector<128xf32>
    %205 = vector.shape_cast %204 : vector<128xf32> to vector<1x128xf32>
    %206 = vector.broadcast %205 : vector<1x128xf32> to vector<2x128xf32>
    %207 = arith.mulf %202, %206 : vector<2x128xf32>
    %208 = arith.addf %188, %207 : vector<2x128xf32>
    %209 = arith.addf %198, %208 : vector<2x128xf32>
    %210 = arith.index_cast %1 : i32 to index
    %c0_43 = arith.constant 0 : index
    %211 = vector.load %arg4[%210, %c0_43] : memref<2x128xf32, #tpu.memory_space<vmem>>, vector<2x128xf32>
    tpu.vector_store %arg4[%210, %c0_43], %209 {strides = array<i32>} : memref<2x128xf32, #tpu.memory_space<vmem>>, vector<2x128xf32>,
    %c1_i32 = arith.constant 1 : i32
    return
  }
  func.func @transform_0(%arg0: i32, %arg1: i32) -> (i32, i32) {
    %c0_i32 = arith.constant 0 : i32
    return %arg1, %arg0 : i32, i32
  }
  func.func @transform_1(%arg0: i32, %arg1: i32) -> (i32, i32) {
    %c0_i32 = arith.constant 0 : i32
    %c0_i32_0 = arith.constant 0 : i32
    return %c0_i32, %arg0 : i32, i32
  }
  func.func @transform_2(%arg0: i32, %arg1: i32) -> (i32, i32) {
    %c0_i32 = arith.constant 0 : i32
    return %arg1, %arg0 : i32, i32
  }
}

</mosaic_0001>

<bundles_post_ra>
// kernel: tpu_custom_call.1
= control target key start
LH: loop header
LB: loop body
LE: loop exit
PB: predicated region body
PF: predicated region fallthrough
CT: control target
= control target key end

     0   :  { %7 = vsyncpa [#allocation3], 0  ;;  %s525_s0 = inlined_call_operand.hbm [shape: f32[2,128], index: 0, kind: input, shape index: {}]   ;;  %s526_s1 = inlined_call_operand.hbm [shape: f32[20,128], index: 1, kind: input, shape index: {}]   ;;  %s527_s2 = inlined_call_operand.hbm [shape: f32[2,128], index: 2, kind: output, shape index: {}]  }
   0x1   :  { %8 = vsyncpa [#allocation6], 0 }
   0x2   :  { %9 = vsyncpa [#allocation4], 0  ;;  %s416_s9 = smov [#allocation2]   ;;  %s417_s11 = smov [#allocation5]  }
   0x3   :  { %s16_s10 = sshll.u32 %s416_s9, 4  ;;  %s25_s12 = sshll.u32 %s417_s11, 4  ;;  %s17_s10 = int_to_ptr.vmem [resolvable:$true] %s16_s10  ;;  %s436_s12 = int_to_ptr.vmem [resolvable:$true] %s25_s12 }
   0x4   :  { %s344_s15 = scalar_lea.hbm %s525_s0, 32 }
   0x5   :  { %p345_p0 = scmp.ne.s32.totalorder %s525_s0, %s344_s15  ;;  %p348_p1 = scmp.lt.u32.totalorder %s344_s15, %s525_s0 }
   0x7   :  { %p350_p2 = pnand %p348_p1, %p345_p0 }
   0x9   :  { %353 = shalt.err (!%p350_p2)
}
   0xa   :  { %s354_s20 = scalar_lea.vmem %s17_s10, 32  ;;  %p359_p4 = scmp.lt.s32.totalorder %s17_s10, %s17_s10 }
   0xb   :  { %p355_p3 = scmp.ne.s32.totalorder %s17_s10, %s354_s20  ;;  %p360_p5 = scmp.lt.s32.totalorder %s354_s20, %s354_s20 }
   0xd   :  { %p361_p6 = por %p360_p5, %p359_p4 }
   0xf   :  { %p362_p7 = pnand %p361_p6, %p355_p3 }
  0x11   :  { %365 = shalt.err (!%p362_p7)
}
  0x12   :  { %19 = dma.hbm_to_vmem [thread:$0]  %s525_s0, 32, %s17_s10, [#allocation3]  }
  0x13   :  { %s366_s25 = scalar_lea.hbm %s526_s1, 384 }
  0x14   :  { %p367_p8 = scmp.ne.s32.totalorder %s526_s1, %s366_s25  ;;  %p370_p9 = scmp.lt.u32.totalorder %s366_s25, %s526_s1 }
  0x16   :  { %p372_p10 = pnand %p370_p9, %p367_p8 }
  0x18   :  { %375 = shalt.err (!%p372_p10)
}
  0x19   :  { %s376_s30 = scalar_lea.vmem %s436_s12, 384  ;;  %p381_p12 = scmp.lt.s32.totalorder %s436_s12, %s436_s12 }
  0x1a   :  { %p377_p11 = scmp.ne.s32.totalorder %s436_s12, %s376_s30  ;;  %p382_p13 = scmp.lt.s32.totalorder %s376_s30, %s376_s30 }
  0x1c   :  { %p383_p0 = por %p382_p13, %p381_p12 }
  0x1e   :  { %p384_p1 = pnand %p383_p0, %p377_p11 }
  0x20   :  { %387 = shalt.err (!%p384_p1)
}
  0x21   :  { %s418_s0 = smov 128   ;;  %s419_s3 = smov 8  }
  0x22   :  { %31 = dma.hbm_to_vmem [thread:$0]  %s526_s1, 384, %s436_s12, [#allocation6], %s418_s0, %s418_s0, %s419_s3  }
  0x23   :  { %410 = dma.done.wait [#allocation3], 32  }
  0x24   :  { %411 = vsyncadd [#allocation3], 4294967264 }
  0x25   :  { %412 = dma.done.wait [#allocation6], 384  }
  0x26   :  { %413 = vsyncadd [#allocation6], 4294966912  ;;  %v467_v0 = vld [vmem:[#allocation2] sm:$0x3]  ;;  %v279_v49 = vld [vmem:[#allocation5] ss:$0 sm:$0xff] }
  0x27   :  { %v39_v1 = vmul.f32 %v467_v0, %v467_v0  ;;  %v41_v2 = vmul.f32 -5.640623, %v467_v0  ;;  %v52_v3 = vmul.f32 -5.046873, %v467_v0  ;;  %v63_v4 = vmul.f32 -4.4531236, %v467_v0 }
  0x28   :  { %v74_v5 = vmul.f32 -3.8593738, %v467_v0  ;;  %v85_v7 = vmul.f32 -3.2656238, %v467_v0  ;;  %v96_v8 = vmul.f32 -2.671874, %v467_v0 }
  0x29   :  { %v475_v6 = vmul.f32 -0.7050779, %v39_v1  ;;  %v107_v9 = vmul.f32 -2.0781243, %v467_v0  ;;  %v118_v17 = vmul.f32 -1.4843745, %v467_v0 }
  0x2a   :  { %v129_v26 = vmul.f32 -0.89062464, %v467_v0  ;;  %v140_v27 = vmul.f32 -0.2968749, %v467_v0  ;;  %v151_v29 = vmul.f32 0.2968749, %v467_v0 }
  0x2b   :  { %v42_v10 = vadd.f32 %v41_v2, %v475_v6  ;;  %v53_v11 = vadd.f32 %v52_v3, %v475_v6  ;;  %v64_v12 = vadd.f32 %v63_v4, %v475_v6  ;;  %v75_v13 = vadd.f32 %v74_v5, %v475_v6  ;;  %v280_v53 = vld [vmem:[#allocation5 + $0x1] ss:$0 sm:$0xff]  ;;  %v281_v58 = vld [vmem:[#allocation5 + $0x2] ss:$0 sm:$0xff]  ;;  %v282_v63 = vld [vmem:[#allocation5 + $0x3] ss:$0 sm:$0xff] }
  0x2c   :  { %v86_v14 = vadd.f32 %v85_v7, %v475_v6  ;;  %v97_v15 = vadd.f32 %v96_v8, %v475_v6  ;;  %v108_v16 = vadd.f32 %v107_v9, %v475_v6  ;;  %v119_v24 = vadd.f32 %v118_v17, %v475_v6  ;;  %v283_v4 = vld [vmem:[#allocation5 + $0x4] ss:$0 sm:$0xff]  ;;  %v284_v9 = vld [vmem:[#allocation5 + $0x5] ss:$0 sm:$0xff]  ;;  %s420_s1 = smov [#allocation7]  }
  0x2d   :  { %v43_v18 = vmul.f32 1.442695, %v42_v10  ;;  %v54_v19 = vmul.f32 1.442695, %v53_v11  ;;  %v65_v20 = vmul.f32 1.442695, %v64_v12  ;;  %v130_v31 = vadd.f32 %v129_v26, %v475_v6 }
  0x2e   :  { %v76_v21 = vmul.f32 1.442695, %v75_v13  ;;  %v87_v22 = vmul.f32 1.442695, %v86_v14  ;;  %v98_v23 = vmul.f32 1.442695, %v97_v15  ;;  %v141_v32 = vadd.f32 %v140_v27, %v475_v6 }
  0x2f   :  { %304 = vpow2.f32 %v43_v18  ;;  %v109_v25 = vmul.f32 1.442695, %v108_v16  ;;  %v120_v28 = vmul.f32 1.442695, %v119_v24  ;;  %v162_v30 = vmul.f32 0.89062464, %v467_v0 }
  0x30   :  { %306 = vpow2.f32 %v54_v19  ;;  %v173_v33 = vmul.f32 1.4843745, %v467_v0  ;;  %v152_v34 = vadd.f32 %v151_v29, %v475_v6  ;;  %v184_v36 = vmul.f32 2.0781243, %v467_v0  ;;  %v285_v13 = vld [vmem:[#allocation5 + $0x6] ss:$0 sm:$0xff] }
  0x31   :  { %308 = vpow2.f32 %v65_v20  ;;  %v163_v35 = vadd.f32 %v162_v30, %v475_v6  ;;  %v131_v37 = vmul.f32 1.442695, %v130_v31  ;;  %v142_v38 = vmul.f32 1.442695, %v141_v32  ;;  %v286_v18 = vld [vmem:[#allocation5 + $0x7] ss:$0 sm:$0xff] }
  0x32   :  { %310 = vpow2.f32 %v76_v21  ;;  %v174_v39 = vadd.f32 %v173_v33, %v475_v6  ;;  %v153_v40 = vmul.f32 1.442695, %v152_v34  ;;  %v185_v42 = vadd.f32 %v184_v36, %v475_v6  ;;  %v288_v26 = vld [vmem:[#allocation5 + $0x9] ss:$0 sm:$0xff]  ;;  %v289_v30 = vld [vmem:[#allocation5 + $0xa] ss:$0 sm:$0xff] }
  0x33   :  { %312 = vpow2.f32 %v87_v22  ;;  %v164_v41 = vmul.f32 1.442695, %v163_v35  ;;  %v195_v44 = vmul.f32 2.671874, %v467_v0  ;;  %v206_v45 = vmul.f32 3.2656238, %v467_v0 }
  0x34   :  { %314 = vpow2.f32 %v98_v23  ;;  %v175_v43 = vmul.f32 1.442695, %v174_v39  ;;  %v186_v46 = vmul.f32 1.442695, %v185_v42  ;;  %v217_v47 = vmul.f32 3.8593738, %v467_v0 }
  0x35   :  { %316 = vpow2.f32 %v109_v25  ;;  %v228_v48 = vmul.f32 4.4531236, %v467_v0  ;;  %v196_v50 = vadd.f32 %v195_v44, %v475_v6  ;;  %v207_v51 = vadd.f32 %v206_v45, %v475_v6  ;;  %v290_v34 = vld [vmem:[#allocation5 + $0xb] ss:$0 sm:$0xff]  ;;  %v292_v42 = vld [vmem:[#allocation5 + $0xd] ss:$0 sm:$0xff] }
  0x36   :  { %318 = vpow2.f32 %v120_v28  ;;  %v239_v52 = vmul.f32 5.046873, %v467_v0  ;;  %v218_v54 = vadd.f32 %v217_v47, %v475_v6  ;;  %v250_v56 = vmul.f32 5.640623, %v467_v0  ;;  %s269_s6 = sshll.u32 %s420_s1, 4  ;;  %s270_s6 = int_to_ptr.vmem [resolvable:$true] %s269_s6 }
  0x37   :  { %320 = vpow2.f32 %v131_v37  ;;  %v229_v55 = vadd.f32 %v228_v48, %v475_v6  ;;  %v197_v59 = vmul.f32 1.442695, %v196_v50  ;;  %v208_v1 = vmul.f32 1.442695, %v207_v51  ;;  %v294_v50 = vld [vmem:[#allocation5 + $0xf] ss:$0 sm:$0xff]  ;;  %p393_p3 = scmp.lt.s32.totalorder %s270_s6, %s270_s6 }
  0x38   :  { %322 = vpow2.f32 %v142_v38  ;;  %v240_v60 = vadd.f32 %v239_v52, %v475_v6  ;;  %v219_v5 = vmul.f32 1.442695, %v218_v54  ;;  %v251_v7 = vadd.f32 %v250_v56, %v475_v6  ;;  %v287_v6 = vld [vmem:[#allocation5 + $0x8] ss:$0 sm:$0xff]  ;;  %v291_v38 = vld [vmem:[#allocation5 + $0xc] ss:$0 sm:$0xff] }
  0x39   :  { %v305_v57 = vpop.eup %304  ;;  %324 = vpow2.f32 %v153_v40  ;;  %v230_v10 = vmul.f32 1.442695, %v229_v55  ;;  %v295_v54 = vld [vmem:[#allocation5 + $0x10] ss:$0 sm:$0xff]  ;;  %s388_s7 = scalar_lea.vmem %s270_s6, 32 }
  0x3a   :  { %v307_v61 = vpop.eup %306  ;;  %v50_v62 = vmul.f32 %v305_v57, %v279_v49  ;;  %326 = vpow2.f32 %v164_v41  ;;  %v241_v14 = vmul.f32 1.442695, %v240_v60  ;;  %v252_v19 = vmul.f32 1.442695, %v251_v7  ;;  %p389_p2 = scmp.ne.s32.totalorder %s270_s6, %s388_s7  ;;  %p394_p4 = scmp.lt.s32.totalorder %s388_s7, %s388_s7 }
  0x3b   :  { %v309_v2 = vpop.eup %308  ;;  %v61_v3 = vmul.f32 %v307_v61, %v280_v53  ;;  %328 = vpow2.f32 %v175_v43 }
  0x3c   :  { %v311_v8 = vpop.eup %310  ;;  %v72_v0 = vmul.f32 %v309_v2, %v281_v58  ;;  %330 = vpow2.f32 %v186_v46  ;;  %v293_v46 = vld [vmem:[#allocation5 + $0xe] ss:$0 sm:$0xff]  ;;  %v296_v58 = vld [vmem:[#allocation5 + $0x11] ss:$0 sm:$0xff]  ;;  %p395_p5 = por %p394_p4, %p393_p3 }
  0x3d   :  { %v313_v11 = vpop.eup %312  ;;  %v83_v12 = vmul.f32 %v311_v8, %v282_v63  ;;  %332 = vpow2.f32 %v197_v59 }
  0x3e   :  { %v315_v15 = vpop.eup %314  ;;  %v73_v16 = vadd.f32 %v72_v0, %v50_v62  ;;  %v94_v17 = vmul.f32 %v313_v11, %v283_v4  ;;  %334 = vpow2.f32 %v208_v1  ;;  %v297_v62 = vld [vmem:[#allocation5 + $0x12] ss:$0 sm:$0xff]  ;;  %p396_p6 = pnand %p395_p5, %p389_p2 }
  0x3f   :  { %v317_v20 = vpop.eup %316  ;;  %v84_v21 = vadd.f32 %v83_v12, %v61_v3  ;;  %v105_v22 = vmul.f32 %v315_v15, %v284_v9  ;;  %336 = vpow2.f32 %v219_v5  ;;  %v298_v3 = vld [vmem:[#allocation5 + $0x13] ss:$0 sm:$0xff] }
  0x40   :  { %v319_v23 = vpop.eup %318  ;;  %v95_v24 = vadd.f32 %v94_v17, %v73_v16  ;;  %v116_v25 = vmul.f32 %v317_v20, %v285_v13  ;;  %338 = vpow2.f32 %v230_v10 }
  0x41   :  { %v321_v27 = vpop.eup %320  ;;  %v106_v28 = vadd.f32 %v105_v22, %v84_v21  ;;  %v127_v29 = vmul.f32 %v319_v23, %v286_v18  ;;  %340 = vpow2.f32 %v241_v14 }
  0x42   :  { %v323_v31 = vpop.eup %322  ;;  %v117_v32 = vadd.f32 %v116_v25, %v95_v24  ;;  %v138_v33 = vmul.f32 %v321_v27, %v287_v6  ;;  %342 = vpow2.f32 %v252_v19 }
  0x43   :  { %v325_v35 = vpop.eup %324  ;;  %v128_v36 = vadd.f32 %v127_v29, %v106_v28  ;;  %v149_v37 = vmul.f32 %v323_v31, %v288_v26 }
  0x44   :  { %v327_v39 = vpop.eup %326  ;;  %v139_v40 = vadd.f32 %v138_v33, %v117_v32  ;;  %v160_v41 = vmul.f32 %v325_v35, %v289_v30 }
  0x45   :  { %v329_v43 = vpop.eup %328  ;;  %v150_v44 = vadd.f32 %v149_v37, %v128_v36  ;;  %v171_v45 = vmul.f32 %v327_v39, %v290_v34 }
  0x46   :  { %v331_v47 = vpop.eup %330  ;;  %v161_v48 = vadd.f32 %v160_v41, %v139_v40  ;;  %v182_v49 = vmul.f32 %v329_v43, %v291_v38 }
  0x47   :  { %v333_v51 = vpop.eup %332  ;;  %v172_v52 = vadd.f32 %v171_v45, %v150_v44  ;;  %v193_v53 = vmul.f32 %v331_v47, %v292_v42 }
  0x48   :  { %v335_v55 = vpop.eup %334  ;;  %v183_v56 = vadd.f32 %v182_v49, %v161_v48  ;;  %v204_v57 = vmul.f32 %v333_v51, %v293_v46 }
  0x49   :  { %v337_v59 = vpop.eup %336  ;;  %v194_v60 = vadd.f32 %v193_v53, %v172_v52  ;;  %v215_v61 = vmul.f32 %v335_v55, %v294_v50 }
  0x4a   :  { %v339_v63 = vpop.eup %338  ;;  %v205_v1 = vadd.f32 %v204_v57, %v183_v56  ;;  %v226_v2 = vmul.f32 %v337_v59, %v295_v54 }
  0x4b   :  { %v341_v4 = vpop.eup %340  ;;  %v216_v5 = vadd.f32 %v215_v61, %v194_v60  ;;  %v237_v7 = vmul.f32 %v339_v63, %v296_v58 }
  0x4c   :  { %v343_v8 = vpop.eup %342  ;;  %v227_v0 = vadd.f32 %v226_v2, %v205_v1  ;;  %v248_v9 = vmul.f32 %v341_v4, %v297_v62 }
  0x4d   :  { %v238_v10 = vadd.f32 %v237_v7, %v216_v5  ;;  %v259_v11 = vmul.f32 %v343_v8, %v298_v3 }
  0x4e   :  { %v249_v12 = vadd.f32 %v248_v9, %v227_v0 }
  0x4f   :  { %v260_v13 = vadd.f32 %v259_v11, %v238_v10 }
  0x51   :  { %v261_v14 = vadd.f32 %v260_v13, %v249_v12 }
  0x53   :  { %262 = vst [vmem:[#allocation7] sm:$0x3] %v261_v14 }
  0x54   :  { %399 = shalt.err (!%p396_p6)
}
  0x55   :  { %s400_s10 = scalar_lea.hbm %s527_s2, 32 }
  0x56   :  { %p401_p7 = scmp.ne.s32.totalorder %s527_s2, %s400_s10  ;;  %p404_p8 = scmp.lt.u32.totalorder %s400_s10, %s527_s2 }
  0x58   :  { %p406_p9 = pnand %p404_p8, %p401_p7 }
  0x5a   :  { %409 = shalt.err (!%p406_p9)
}
  0x5b   :  { %272 = dma.vmem_to_hbm [thread:$0]  %s270_s6, 32, %s527_s2, [#allocation4]  }
  0x5c   :  { %414 = dma.done.wait [#allocation4], 32  }
  0x5d   :  { %415 = vsyncadd [#allocation4], 4294967264 }
  0x5e   :  { %276 = vsyncpa [#allocation3], 1 }
  0x5f   :  { %277 = vsyncpa [#allocation6], 1 }
  0x60   :  { %278 = vsyncpa [#allocation4], 1 }

</bundles_post_ra>
